<compile_context>
chip_gen: v6e
topology: v6e:2x2x1
jax: 0.10.0
libtpu: 0.0.40
codegen_flags: <defaults>
</compile_context>

<pallas_src>
import functools

import jax
import jax.numpy as jnp
from jax.experimental import pallas as pl
from jax.experimental.pallas import tpu as pltpu

LANES = 128                    # pad channel / contraction dims to the lane width
COMPUTE_DTYPE = jnp.bfloat16   # MXU input dtype (accumulation stays f32)


def _round_up(x, m):
    return (x + m - 1) // m * m


# ----------------------------------------------------------------------------
# Fused kernel: conv1+bn1+relu -> conv2+bn2 (+ 1x1 shortcut conv3+bn3) -> relu
# ----------------------------------------------------------------------------
def _basic_block_kernel(p1_ref, w13_ref, b13_ref, w2_ref, out_ref, y1pad_ref,
                        *, kh, kw, pad, ho, wo, cpad):
    # Zero the haloed y1 scratch: the border is conv2's zero padding.  Re-zero
    # every grid step (not only step 0) so the kernel stays correct when the
    # "parallel" batch axis is sharded across TensorCores (v7x megacore).
    y1pad_ref[...] = jnp.zeros_like(y1pad_ref)

    # conv1 + shortcut in ONE MXU matmul: w13 = [w1*bn1_scale | w3*bn3_scale],
    # the shortcut weight living in the centre-tap rows of the conv1 patches.
    p1 = p1_ref[0]                                                  # (ho*wo, K1pad) bf16
    t = jnp.dot(p1, w13_ref[...], preferred_element_type=jnp.float32)
    t = t + b13_ref[...]                                            # [b1 | b2+b3]

    y1 = jnp.maximum(t[:, :cpad], 0.0)                              # conv1+bn1+relu (f32)
    acc = t[:, cpad:]                                               # shortcut + bn2/bn3 bias

    # y1 never leaves VMEM: write it into the interior of the haloed scratch.
    # Padded channels of y1 are relu(0 + 0) = 0, so they feed zeros to conv2.
    y1pad_ref[pad:pad + ho, pad:pad + wo, :] = y1.reshape(ho, wo, cpad)

    # conv2 as kh*kw shifted matmuls accumulated in f32 (no im2col duplication,
    # no HBM traffic for the patches).  Slices/reshapes are tile-aligned
    # (wo == 8, cpad == 128), so they are layout-trivial.
    for ki in range(kh):
        for kj in range(kw):
            patch = y1pad_ref[ki:ki + ho, kj:kj + wo, :].reshape(ho * wo, cpad)
            acc = acc + jnp.dot(patch.astype(COMPUTE_DTYPE), w2_ref[ki, kj],
                                preferred_element_type=jnp.float32)

    out_ref[0] = jnp.maximum(acc, 0.0).astype(out_ref.dtype)        # residual ReLU


# ----------------------------------------------------------------------------
# Glue: im2col for conv1 only, eval-mode BatchNorm folding, weight packing
# ----------------------------------------------------------------------------
def _bn_scale_bias(bn_stats, eps=1e-5):
    gamma, beta, mean, var = bn_stats
    scale = gamma / jnp.sqrt(var + eps)
    return scale, beta - mean * scale


def im2col(x_nhwc, kh, kw, stride, pad):
    """Conv patches -> (N, Ho*Wo, kh*kw*C), column order (ki, kj, c)."""
    N, H, W, C = x_nhwc.shape
    xp = jnp.pad(x_nhwc, ((0, 0), (pad, pad), (pad, pad), (0, 0)))
    Ho = (H + 2 * pad - kh) // stride + 1
    Wo = (W + 2 * pad - kw) // stride + 1
    slabs = []
    for i in range(kh):
        for j in range(kw):
            slabs.append(xp[:, i:i + stride * Ho:stride, j:j + stride * Wo:stride, :])
    p = jnp.stack(slabs, axis=3)                       # (N, Ho, Wo, kh*kw, C)
    return p.reshape(N, Ho * Wo, kh * kw * C), (Ho, Wo)


def basic_block_forward(x_nhwc, params, *, kernel_size, stride):
    kh = kw = kernel_size
    pad = (kernel_size - 1) // 2
    N, H, W, cin = x_nhwc.shape
    cout = params["w1"].shape[0]
    cpad = _round_up(cout, LANES)
    K1 = kh * kw * cin
    K1pad = _round_up(K1, LANES)

    # conv1 im2col (the only XLA-side patch extraction; conv2 patches are
    # produced in-kernel from the VMEM y1 scratch).  K zero-padded to lanes.
    x_bf = x_nhwc.astype(COMPUTE_DTYPE)
    p1, (Ho, Wo) = im2col(x_bf, kh, kw, stride, pad)
    p1 = jnp.pad(p1, ((0, 0), (0, 0), (0, K1pad - K1)))
    Mimg = Ho * Wo

    # ---- fold eval-mode BatchNorm into the conv weights ----------------------
    s1, b1 = _bn_scale_bias(params["bn1"])
    s2, b2 = _bn_scale_bias(params["bn2"])
    s3, b3 = _bn_scale_bias(params["bn3"])

    # Combined conv1 | shortcut weight: (K1pad, 2*cpad).  The 1x1/stride
    # shortcut reads x[stride*i, stride*j], which is exactly the centre tap of
    # the conv1 patch, so its weight occupies the centre-tap rows.
    w1 = jnp.transpose(params["w1"], (2, 3, 1, 0)).reshape(K1, cout) * s1[None, :]
    w3 = params["w3"][:, :, 0, 0].T * s3[None, :]                   # (cin, cout)
    ctr = (pad * kw + pad) * cin
    w13 = jnp.zeros((K1pad, 2 * cpad), jnp.float32)
    w13 = w13.at[:K1, :cout].set(w1)
    w13 = w13.at[ctr:ctr + cin, cpad:cpad + cout].set(w3)
    w13 = w13.astype(COMPUTE_DTYPE)

    # Combined bias [bn1 | bn2+bn3]; padded lanes stay 0 so padded y1 channels
    # are exactly zero after the ReLU.
    b13 = jnp.zeros((1, 2 * cpad), jnp.float32)
    b13 = b13.at[0, :cout].set(b1)
    b13 = b13.at[0, cpad:cpad + cout].set(b2 + b3)

    # conv2 weight with bn2 scale folded: (kh, kw, cpad, cpad), zero-padded.
    w2 = jnp.transpose(params["w2"], (2, 3, 1, 0)) * s2[None, None, None, :]
    w2 = jnp.pad(w2, ((0, 0), (0, 0), (0, cpad - cout), (0, cpad - cout)))
    w2 = w2.astype(COMPUTE_DTYPE)

    # ---- one fused pallas_call, pipelined over the batch ---------------------
    # Per-step VMEM: p1 16KB*2 + w13 64KB*2 + b13 1KB*2 + w2 294KB*2 +
    # out 16KB*2 + scratch 51KB ~= 0.8 MiB -> well under the 16 MiB (v5e) /
    # 32 MiB (v6e/v7x) default scoped limits; no vmem_limit override needed.
    kernel = functools.partial(_basic_block_kernel, kh=kh, kw=kw, pad=pad,
                               ho=Ho, wo=Wo, cpad=cpad)
    flops = 2 * N * Mimg * (K1pad * 2 * cpad + kh * kw * cpad * cpad)
    bytes_accessed = (p1.size * 2 + w13.size * 2 + b13.size * 4 + w2.size * 2
                      + N * Mimg * cpad * 2)

    out = pl.pallas_call(
        kernel,
        out_shape=jax.ShapeDtypeStruct((N, Mimg, cpad), COMPUTE_DTYPE),
        grid=(N,),
        in_specs=[
            pl.BlockSpec((1, Mimg, K1pad), lambda b: (b, 0, 0)),        # streamed
            pl.BlockSpec((K1pad, 2 * cpad), lambda b: (0, 0)),          # resident
            pl.BlockSpec((1, 2 * cpad), lambda b: (0, 0)),              # resident
            pl.BlockSpec((kh, kw, cpad, cpad), lambda b: (0, 0, 0, 0)), # resident
        ],
        out_specs=pl.BlockSpec((1, Mimg, cpad), lambda b: (b, 0, 0)),   # lane-dense
        scratch_shapes=[pltpu.VMEM((Ho + kh - 1, Wo + kw - 1, cpad), jnp.float32)],
        compiler_params=pltpu.CompilerParams(dimension_semantics=("parallel",)),
        cost_estimate=pl.CostEstimate(flops=flops, transcendentals=0,
                                      bytes_accessed=bytes_accessed),
    )(p1, w13, b13, w2)

    # Drop the padded output channels; back to NHWC.
    return out[:, :, :cout].astype(jnp.float32).reshape(N, Ho, Wo, cout)


# ----------------------------------------------------------------------------
# Pure-JAX f32 reference (sanity check)
# ----------------------------------------------------------------------------
def _conv_nhwc(x, w_oihw, stride, pad):
    return jax.lax.conv_general_dilated(
        x, jnp.transpose(w_oihw, (2, 3, 1, 0)),            # HWIO
        window_strides=(stride, stride), padding=[(pad, pad), (pad, pad)],
        dimension_numbers=("NHWC", "HWIO", "NHWC"))


def basic_block_reference(x_nhwc, params, *, kernel_size, stride):
    pad = (kernel_size - 1) // 2

    def bn(x, stats):
        g, b, m, v = stats
        return (x - m) / jnp.sqrt(v + 1e-5) * g + b

    out = jax.nn.relu(bn(_conv_nhwc(x_nhwc, params["w1"], stride, pad), params["bn1"]))
    out = bn(_conv_nhwc(out, params["w2"], 1, pad), params["bn2"])
    sc = bn(_conv_nhwc(x_nhwc, params["w3"], stride, 0), params["bn3"])
    return jax.nn.relu(out + sc)


# ----------------------------------------------------------------------------
if __name__ == "__main__":
    inplanes, outplanes, kernel_size, stride = 4, 8, 3, 2
    N, H, W = 2, 16, 16

    key = jax.random.PRNGKey(0)
    ks = jax.random.split(key, 12)

    def bn_params(kg, kb, c):
        gamma = jax.random.uniform(kg, (c,), jnp.float32, 0.5, 1.5)
        beta = jax.random.normal(kb, (c,)) * 0.1
        running_mean = jnp.linspace(-0.2, 0.2, c).astype(jnp.float32)
        running_var = jnp.linspace(0.8, 1.2, c).astype(jnp.float32)
        return (gamma, beta, running_mean, running_var)

    params = {
        "w1": jax.random.normal(ks[0], (outplanes, inplanes, kernel_size, kernel_size)) * 0.1,
        "w2": jax.random.normal(ks[1], (outplanes, outplanes, kernel_size, kernel_size)) * 0.1,
        "w3": jax.random.normal(ks[2], (outplanes, inplanes, 1, 1)) * 0.1,
        "bn1": bn_params(ks[3], ks[4], outplanes),
        "bn2": bn_params(ks[5], ks[6], outplanes),
        "bn3": bn_params(ks[7], ks[8], outplanes),
    }

    # PyTorch-style NCHW input -> NHWC for the kernel.
    x_nchw = jax.random.normal(ks[9], (N, inplanes, H, W), jnp.float32)
    x_nhwc = jnp.transpose(x_nchw, (0, 2, 3, 1))

    fwd = jax.jit(functools.partial(basic_block_forward,
                                    kernel_size=kernel_size, stride=stride))
    out = jax.block_until_ready(fwd(x_nhwc, params))

    ref = basic_block_reference(x_nhwc, params, kernel_size=kernel_size, stride=stride)
    assert out.shape == (N, H // stride, W // stride, outplanes), out.shape
    # Tolerance reflects bf16 matmul inputs/weights and the bf16 output store
    # (accumulation stays f32 on the MXU).
    assert jnp.allclose(out, ref, atol=1e-1, rtol=1e-1), float(jnp.max(jnp.abs(out - ref)))

    print("KERNEL_OK")
</pallas_src>

<mosaic_0001>
module attributes {stable_mosaic.version = 11 : i64} {
  func.func @_basic_block_kernel(%arg0: i32, %arg1: memref<1x64x128xbf16, #tpu.memory_space<vmem>>, %arg2: memref<128x256xbf16, #tpu.memory_space<vmem>>, %arg3: memref<1x256xf32, #tpu.memory_space<vmem>>, %arg4: memref<3x3x128x128xbf16, #tpu.memory_space<vmem>>, %arg5: memref<1x64x128xbf16, #tpu.memory_space<vmem>>, %arg6: memref<10x10x128xf32, #tpu.memory_space<vmem>>) attributes {dimension_semantics = [#tpu.dimension_semantics<parallel>], iteration_bounds = array<i64: 2>, scalar_prefetch = 0 : i64, scratch_operands = 1 : i64, tpu.core_type = #tpu.core_type<tc>, window_params = [{transform_indices = @transform_0, window_bounds = array<i64: 1, 64, 128>}, {pipeline_mode = #tpu.pipeline_mode<synchronous>, transform_indices = @transform_1, window_bounds = array<i64: 128, 256>}, {pipeline_mode = #tpu.pipeline_mode<synchronous>, transform_indices = @transform_2, window_bounds = array<i64: 1, 256>}, {pipeline_mode = #tpu.pipeline_mode<synchronous>, transform_indices = @transform_3, window_bounds = array<i64: 3, 3, 128, 128>}, {transform_indices = @transform_4, window_bounds = array<i64: 1, 64, 128>}]} {
    %cst = arith.constant 0.000000e+00 : f32
    %0 = vector.broadcast %cst : f32 to vector<10x10x128xf32>
    %c0 = arith.constant 0 : index
    %c0_0 = arith.constant 0 : index
    %c0_1 = arith.constant 0 : index
    %1 = vector.load %arg6[%c0, %c0_0, %c0_1] : memref<10x10x128xf32, #tpu.memory_space<vmem>>, vector<10x10x128xf32>
    tpu.vector_store %arg6[%c0, %c0_0, %c0_1], %0 {strides = array<i32>} : memref<10x10x128xf32, #tpu.memory_space<vmem>>, vector<10x10x128xf32>,
    %c0_2 = arith.constant 0 : index
    %c0_3 = arith.constant 0 : index
    %c0_4 = arith.constant 0 : index
    %2 = vector.load %arg1[%c0_2, %c0_3, %c0_4] : memref<1x64x128xbf16, #tpu.memory_space<vmem>>, vector<1x64x128xbf16>
    %3 = vector.shape_cast %2 : vector<1x64x128xbf16> to vector<64x128xbf16>
    %c0_5 = arith.constant 0 : index
    %c0_6 = arith.constant 0 : index
    %4 = vector.load %arg2[%c0_5, %c0_6] : memref<128x256xbf16, #tpu.memory_space<vmem>>, vector<128x256xbf16>
    %cst_7 = arith.constant dense<0.000000e+00> : vector<64x256xf32>
    %5 = tpu.matmul %3, %4, %cst_7 {dimension_numbers = #tpu.dot_dimension_numbers<[1], [0], [0], [1], [0, 0, 1, 1], [], []>} : vector<64x128xbf16>, vector<128x256xbf16>, vector<64x256xf32> -> vector<64x256xf32>
    %c0_8 = arith.constant 0 : index
    %c0_9 = arith.constant 0 : index
    %6 = vector.load %arg3[%c0_8, %c0_9] : memref<1x256xf32, #tpu.memory_space<vmem>>, vector<1x256xf32>
    %7 = vector.broadcast %6 : vector<1x256xf32> to vector<64x256xf32>
    %8 = arith.addf %5, %7 : vector<64x256xf32>
    %9 = vector.extract_strided_slice %8 {offsets = [0, 0], sizes = [64, 128], strides = [1, 1]} : vector<64x256xf32> to vector<64x128xf32>
    %cst_10 = arith.constant 0.000000e+00 : f32
    %10 = vector.broadcast %cst_10 : f32 to vector<64x128xf32>
    %11 = arith.maximumf %9, %10 : vector<64x128xf32>
    %12 = vector.extract_strided_slice %8 {offsets = [0, 128], sizes = [64, 128], strides = [1, 1]} : vector<64x256xf32> to vector<64x128xf32>
    %13 = vector.shape_cast %11 : vector<64x128xf32> to vector<8x8x128xf32>
    %c1 = arith.constant 1 : index
    %c1_11 = arith.constant 1 : index
    %c0_12 = arith.constant 0 : index
    %14 = vector.load %arg6[%c1, %c1_11, %c0_12] : memref<10x10x128xf32, #tpu.memory_space<vmem>>, vector<8x8x128xf32>
    tpu.vector_store %arg6[%c1, %c1_11, %c0_12], %13 {strides = array<i32>} : memref<10x10x128xf32, #tpu.memory_space<vmem>>, vector<8x8x128xf32>,
    %c0_13 = arith.constant 0 : index
    %c0_14 = arith.constant 0 : index
    %c0_15 = arith.constant 0 : index
    %15 = vector.load %arg6[%c0_13, %c0_14, %c0_15] : memref<10x10x128xf32, #tpu.memory_space<vmem>>, vector<8x8x128xf32>
    %16 = vector.shape_cast %15 : vector<8x8x128xf32> to vector<64x128xf32>
    %17 = arith.truncf %16 : vector<64x128xf32> to vector<64x128xbf16>
    %c0_16 = arith.constant 0 : index
    %c0_17 = arith.constant 0 : index
    %c0_18 = arith.constant 0 : index
    %c0_19 = arith.constant 0 : index
    %18 = vector.load %arg4[%c0_16, %c0_17, %c0_18, %c0_19] : memref<3x3x128x128xbf16, #tpu.memory_space<vmem>>, vector<1x1x128x128xbf16>
    %19 = vector.shape_cast %18 : vector<1x1x128x128xbf16> to vector<128x128xbf16>
    %cst_20 = arith.constant dense<0.000000e+00> : vector<64x128xf32>
    %20 = tpu.matmul %17, %19, %cst_20 {dimension_numbers = #tpu.dot_dimension_numbers<[1], [0], [0], [1], [0, 0, 1, 1], [], []>} : vector<64x128xbf16>, vector<128x128xbf16>, vector<64x128xf32> -> vector<64x128xf32>
    %21 = arith.addf %12, %20 : vector<64x128xf32>
    %c0_21 = arith.constant 0 : index
    %c1_22 = arith.constant 1 : index
    %c0_23 = arith.constant 0 : index
    %22 = vector.load %arg6[%c0_21, %c1_22, %c0_23] : memref<10x10x128xf32, #tpu.memory_space<vmem>>, vector<8x8x128xf32>
    %23 = vector.shape_cast %22 : vector<8x8x128xf32> to vector<64x128xf32>
    %24 = arith.truncf %23 : vector<64x128xf32> to vector<64x128xbf16>
    %c0_24 = arith.constant 0 : index
    %c1_25 = arith.constant 1 : index
    %c0_26 = arith.constant 0 : index
    %c0_27 = arith.constant 0 : index
    %25 = vector.load %arg4[%c0_24, %c1_25, %c0_26, %c0_27] : memref<3x3x128x128xbf16, #tpu.memory_space<vmem>>, vector<1x1x128x128xbf16>
    %26 = vector.shape_cast %25 : vector<1x1x128x128xbf16> to vector<128x128xbf16>
    %cst_28 = arith.constant dense<0.000000e+00> : vector<64x128xf32>
    %27 = tpu.matmul %24, %26, %cst_28 {dimension_numbers = #tpu.dot_dimension_numbers<[1], [0], [0], [1], [0, 0, 1, 1], [], []>} : vector<64x128xbf16>, vector<128x128xbf16>, vector<64x128xf32> -> vector<64x128xf32>
    %28 = arith.addf %21, %27 : vector<64x128xf32>
    %c0_29 = arith.constant 0 : index
    %c2 = arith.constant 2 : index
    %c0_30 = arith.constant 0 : index
    %29 = vector.load %arg6[%c0_29, %c2, %c0_30] : memref<10x10x128xf32, #tpu.memory_space<vmem>>, vector<8x8x128xf32>
    %30 = vector.shape_cast %29 : vector<8x8x128xf32> to vector<64x128xf32>
    %31 = arith.truncf %30 : vector<64x128xf32> to vector<64x128xbf16>
    %c0_31 = arith.constant 0 : index
    %c2_32 = arith.constant 2 : index
    %c0_33 = arith.constant 0 : index
    %c0_34 = arith.constant 0 : index
    %32 = vector.load %arg4[%c0_31, %c2_32, %c0_33, %c0_34] : memref<3x3x128x128xbf16, #tpu.memory_space<vmem>>, vector<1x1x128x128xbf16>
    %33 = vector.shape_cast %32 : vector<1x1x128x128xbf16> to vector<128x128xbf16>
    %cst_35 = arith.constant dense<0.000000e+00> : vector<64x128xf32>
    %34 = tpu.matmul %31, %33, %cst_35 {dimension_numbers = #tpu.dot_dimension_numbers<[1], [0], [0], [1], [0, 0, 1, 1], [], []>} : vector<64x128xbf16>, vector<128x128xbf16>, vector<64x128xf32> -> vector<64x128xf32>
    %35 = arith.addf %28, %34 : vector<64x128xf32>
    %c1_36 = arith.constant 1 : index
    %c0_37 = arith.constant 0 : index
    %c0_38 = arith.constant 0 : index
    %36 = vector.load %arg6[%c1_36, %c0_37, %c0_38] : memref<10x10x128xf32, #tpu.memory_space<vmem>>, vector<8x8x128xf32>
    %37 = vector.shape_cast %36 : vector<8x8x128xf32> to vector<64x128xf32>
    %38 = arith.truncf %37 : vector<64x128xf32> to vector<64x128xbf16>
    %c1_39 = arith.constant 1 : index
    %c0_40 = arith.constant 0 : index
    %c0_41 = arith.constant 0 : index
    %c0_42 = arith.constant 0 : index
    %39 = vector.load %arg4[%c1_39, %c0_40, %c0_41, %c0_42] : memref<3x3x128x128xbf16, #tpu.memory_space<vmem>>, vector<1x1x128x128xbf16>
    %40 = vector.shape_cast %39 : vector<1x1x128x128xbf16> to vector<128x128xbf16>
    %cst_43 = arith.constant dense<0.000000e+00> : vector<64x128xf32>
    %41 = tpu.matmul %38, %40, %cst_43 {dimension_numbers = #tpu.dot_dimension_numbers<[1], [0], [0], [1], [0, 0, 1, 1], [], []>} : vector<64x128xbf16>, vector<128x128xbf16>, vector<64x128xf32> -> vector<64x128xf32>
    %42 = arith.addf %35, %41 : vector<64x128xf32>
    %c1_44 = arith.constant 1 : index
    %c1_45 = arith.constant 1 : index
    %c0_46 = arith.constant 0 : index
    %43 = vector.load %arg6[%c1_44, %c1_45, %c0_46] : memref<10x10x128xf32, #tpu.memory_space<vmem>>, vector<8x8x128xf32>
    %44 = vector.shape_cast %43 : vector<8x8x128xf32> to vector<64x128xf32>
    %45 = arith.truncf %44 : vector<64x128xf32> to vector<64x128xbf16>
    %c1_47 = arith.constant 1 : index
    %c1_48 = arith.constant 1 : index
    %c0_49 = arith.constant 0 : index
    %c0_50 = arith.constant 0 : index
    %46 = vector.load %arg4[%c1_47, %c1_48, %c0_49, %c0_50] : memref<3x3x128x128xbf16, #tpu.memory_space<vmem>>, vector<1x1x128x128xbf16>
    %47 = vector.shape_cast %46 : vector<1x1x128x128xbf16> to vector<128x128xbf16>
    %cst_51 = arith.constant dense<0.000000e+00> : vector<64x128xf32>
    %48 = tpu.matmul %45, %47, %cst_51 {dimension_numbers = #tpu.dot_dimension_numbers<[1], [0], [0], [1], [0, 0, 1, 1], [], []>} : vector<64x128xbf16>, vector<128x128xbf16>, vector<64x128xf32> -> vector<64x128xf32>
    %49 = arith.addf %42, %48 : vector<64x128xf32>
    %c1_52 = arith.constant 1 : index
    %c2_53 = arith.constant 2 : index
    %c0_54 = arith.constant 0 : index
    %50 = vector.load %arg6[%c1_52, %c2_53, %c0_54] : memref<10x10x128xf32, #tpu.memory_space<vmem>>, vector<8x8x128xf32>
    %51 = vector.shape_cast %50 : vector<8x8x128xf32> to vector<64x128xf32>
    %52 = arith.truncf %51 : vector<64x128xf32> to vector<64x128xbf16>
    %c1_55 = arith.constant 1 : index
    %c2_56 = arith.constant 2 : index
    %c0_57 = arith.constant 0 : index
    %c0_58 = arith.constant 0 : index
    %53 = vector.load %arg4[%c1_55, %c2_56, %c0_57, %c0_58] : memref<3x3x128x128xbf16, #tpu.memory_space<vmem>>, vector<1x1x128x128xbf16>
    %54 = vector.shape_cast %53 : vector<1x1x128x128xbf16> to vector<128x128xbf16>
    %cst_59 = arith.constant dense<0.000000e+00> : vector<64x128xf32>
    %55 = tpu.matmul %52, %54, %cst_59 {dimension_numbers = #tpu.dot_dimension_numbers<[1], [0], [0], [1], [0, 0, 1, 1], [], []>} : vector<64x128xbf16>, vector<128x128xbf16>, vector<64x128xf32> -> vector<64x128xf32>
    %56 = arith.addf %49, %55 : vector<64x128xf32>
    %c2_60 = arith.constant 2 : index
    %c0_61 = arith.constant 0 : index
    %c0_62 = arith.constant 0 : index
    %57 = vector.load %arg6[%c2_60, %c0_61, %c0_62] : memref<10x10x128xf32, #tpu.memory_space<vmem>>, vector<8x8x128xf32>
    %58 = vector.shape_cast %57 : vector<8x8x128xf32> to vector<64x128xf32>
    %59 = arith.truncf %58 : vector<64x128xf32> to vector<64x128xbf16>
    %c2_63 = arith.constant 2 : index
    %c0_64 = arith.constant 0 : index
    %c0_65 = arith.constant 0 : index
    %c0_66 = arith.constant 0 : index
    %60 = vector.load %arg4[%c2_63, %c0_64, %c0_65, %c0_66] : memref<3x3x128x128xbf16, #tpu.memory_space<vmem>>, vector<1x1x128x128xbf16>
    %61 = vector.shape_cast %60 : vector<1x1x128x128xbf16> to vector<128x128xbf16>
    %cst_67 = arith.constant dense<0.000000e+00> : vector<64x128xf32>
    %62 = tpu.matmul %59, %61, %cst_67 {dimension_numbers = #tpu.dot_dimension_numbers<[1], [0], [0], [1], [0, 0, 1, 1], [], []>} : vector<64x128xbf16>, vector<128x128xbf16>, vector<64x128xf32> -> vector<64x128xf32>
    %63 = arith.addf %56, %62 : vector<64x128xf32>
    %c2_68 = arith.constant 2 : index
    %c1_69 = arith.constant 1 : index
    %c0_70 = arith.constant 0 : index
    %64 = vector.load %arg6[%c2_68, %c1_69, %c0_70] : memref<10x10x128xf32, #tpu.memory_space<vmem>>, vector<8x8x128xf32>
    %65 = vector.shape_cast %64 : vector<8x8x128xf32> to vector<64x128xf32>
    %66 = arith.truncf %65 : vector<64x128xf32> to vector<64x128xbf16>
    %c2_71 = arith.constant 2 : index
    %c1_72 = arith.constant 1 : index
    %c0_73 = arith.constant 0 : index
    %c0_74 = arith.constant 0 : index
    %67 = vector.load %arg4[%c2_71, %c1_72, %c0_73, %c0_74] : memref<3x3x128x128xbf16, #tpu.memory_space<vmem>>, vector<1x1x128x128xbf16>
    %68 = vector.shape_cast %67 : vector<1x1x128x128xbf16> to vector<128x128xbf16>
    %cst_75 = arith.constant dense<0.000000e+00> : vector<64x128xf32>
    %69 = tpu.matmul %66, %68, %cst_75 {dimension_numbers = #tpu.dot_dimension_numbers<[1], [0], [0], [1], [0, 0, 1, 1], [], []>} : vector<64x128xbf16>, vector<128x128xbf16>, vector<64x128xf32> -> vector<64x128xf32>
    %70 = arith.addf %63, %69 : vector<64x128xf32>
    %c2_76 = arith.constant 2 : index
    %c2_77 = arith.constant 2 : index
    %c0_78 = arith.constant 0 : index
    %71 = vector.load %arg6[%c2_76, %c2_77, %c0_78] : memref<10x10x128xf32, #tpu.memory_space<vmem>>, vector<8x8x128xf32>
    %72 = vector.shape_cast %71 : vector<8x8x128xf32> to vector<64x128xf32>
    %73 = arith.truncf %72 : vector<64x128xf32> to vector<64x128xbf16>
    %c2_79 = arith.constant 2 : index
    %c2_80 = arith.constant 2 : index
    %c0_81 = arith.constant 0 : index
    %c0_82 = arith.constant 0 : index
    %74 = vector.load %arg4[%c2_79, %c2_80, %c0_81, %c0_82] : memref<3x3x128x128xbf16, #tpu.memory_space<vmem>>, vector<1x1x128x128xbf16>
    %75 = vector.shape_cast %74 : vector<1x1x128x128xbf16> to vector<128x128xbf16>
    %cst_83 = arith.constant dense<0.000000e+00> : vector<64x128xf32>
    %76 = tpu.matmul %73, %75, %cst_83 {dimension_numbers = #tpu.dot_dimension_numbers<[1], [0], [0], [1], [0, 0, 1, 1], [], []>} : vector<64x128xbf16>, vector<128x128xbf16>, vector<64x128xf32> -> vector<64x128xf32>
    %77 = arith.addf %70, %76 : vector<64x128xf32>
    %cst_84 = arith.constant 0.000000e+00 : f32
    %78 = vector.broadcast %cst_84 : f32 to vector<64x128xf32>
    %79 = arith.maximumf %77, %78 : vector<64x128xf32>
    %80 = arith.truncf %79 : vector<64x128xf32> to vector<64x128xbf16>
    %c0_85 = arith.constant 0 : index
    %c0_86 = arith.constant 0 : index
    %c0_87 = arith.constant 0 : index
    %81 = vector.load %arg5[%c0_85, %c0_86, %c0_87] : memref<1x64x128xbf16, #tpu.memory_space<vmem>>, vector<1x64x128xbf16>
    %82 = vector.shape_cast %81 : vector<1x64x128xbf16> to vector<64x128xbf16>
    %83 = vector.shape_cast %80 : vector<64x128xbf16> to vector<1x64x128xbf16>
    tpu.vector_store %arg5[%c0_85, %c0_86, %c0_87], %83 {strides = array<i32>} : memref<1x64x128xbf16, #tpu.memory_space<vmem>>, vector<1x64x128xbf16>,
    return
  }
  func.func @transform_0(%arg0: i32) -> (i32, i32, i32) {
    %c0_i32 = arith.constant 0 : i32
    %c0_i32_0 = arith.constant 0 : i32
    %c0_i32_1 = arith.constant 0 : i32
    return %arg0, %c0_i32, %c0_i32_0 : i32, i32, i32
  }
  func.func @transform_1(%arg0: i32) -> (i32, i32) {
    %c0_i32 = arith.constant 0 : i32
    %c0_i32_0 = arith.constant 0 : i32
    %c0_i32_1 = arith.constant 0 : i32
    return %c0_i32, %c0_i32_0 : i32, i32
  }
  func.func @transform_2(%arg0: i32) -> (i32, i32) {
    %c0_i32 = arith.constant 0 : i32
    %c0_i32_0 = arith.constant 0 : i32
    %c0_i32_1 = arith.constant 0 : i32
    return %c0_i32, %c0_i32_0 : i32, i32
  }
  func.func @transform_3(%arg0: i32) -> (i32, i32, i32, i32) {
    %c0_i32 = arith.constant 0 : i32
    %c0_i32_0 = arith.constant 0 : i32
    %c0_i32_1 = arith.constant 0 : i32
    %c0_i32_2 = arith.constant 0 : i32
    %c0_i32_3 = arith.constant 0 : i32
    return %c0_i32, %c0_i32_0, %c0_i32_1, %c0_i32_2 : i32, i32, i32, i32
  }
  func.func @transform_4(%arg0: i32) -> (i32, i32, i32) {
    %c0_i32 = arith.constant 0 : i32
    %c0_i32_0 = arith.constant 0 : i32
    %c0_i32_1 = arith.constant 0 : i32
    return %arg0, %c0_i32, %c0_i32_0 : i32, i32, i32
  }
}

</mosaic_0001>

<bundles_post_ra>
// kernel: basic_block_forward.1
= control target key start
LH: loop header
LB: loop body
LE: loop exit
PB: predicated region body
PF: predicated region fallthrough
CT: control target
= control target key end

     0   :  { %s2644_s15 = smov 0   ;;  %s3165_s0 = inlined_call_operand.vmem [shape: bf16[2,64,128], index: 0, kind: input, shape index: {}]   ;;  %s3166_s1 = inlined_call_operand.vmem [shape: bf16[128,256], index: 1, kind: input, shape index: {}]   ;;  %s3167_s2 = inlined_call_operand.vmem [shape: f32[1,256], index: 2, kind: input, shape index: {}]   ;;  %s3168_s3 = inlined_call_operand.vmem [shape: bf16[3,3,128,128], index: 3, kind: input, shape index: {}]   ;;  %s3169_s4 = inlined_call_operand.vmem [shape: bf16[2,64,128], index: 4, kind: output, shape index: {}]  }
   0x1 LB: > { %s1902_s16 = sadd.s32 4294967295, %s2615_s15   ;;  %p1906_p0 = scmp.ge.s32.totalorder %s2615_s15, 1  ;;  %s2615_s15 = sphi %s2644_s15, %s14_s15  }
   0x2   : > { %p162_p1 = scmp.lt.s32.totalorder %s2615_s15, 3 }
   0x4   : > { %p163_p2 = pnand %p1906_p0, %p162_p1 }
   0x6   : > { %166 = sbr.rel (%p163_p2) target bundleno = 601 (0x259), region = 36 }
   0xb   : > { %v2508_v0 = vld [vmem:[%s3166_s1 + $0x74] ss:$8 sps:$4 sm:$0xff]   ;;  %p188_p3 = scmp.lt.s32.totalorder %s1902_s16, 1  ;;  %v2510_v1 = vld [vmem:[%s3166_s1 + $0x70] ss:$8 sps:$4 sm:$0xff]   ;;  %v2617_v2 = vmov 0   ;;  %v245_v40 = vlaneseq }
   0xc   : > { %391 = vmatprep.mubr.bf16.mxu0 %v2617_v2  ;;  %359 = vmatprep.subr.bf16.mxu0 %v2508_v0  ;;  %v2511_v3 = vld [vmem:[%s3166_s1 + $0x64] ss:$8 sps:$4 sm:$0xff]   ;;  %v2618_v4 = vmov 0.0   ;;  %v2513_v5 = vld [vmem:[%s3166_s1 + $0x60] ss:$8 sps:$4 sm:$0xff]   ;;  %v2536_v12 = vld [vmem:[%s3168_s3 + $0x38] sm:$0xff]  }
   0xd   : > { %s3191_s16 = smov (!%p188_p3, %s1902_s16), 1  ;;  %201 = vst [vmem:[#allocation2 + $0x10] sm:$0xff] %v2618_v4  ;;  %202 = vst [vmem:[#allocation2 + $0x18] sm:$0x3] %v2618_v4  ;;  %360 = vmatpush1.bf16.msra.mxu0 %v2510_v1  ;;  %v2514_v6 = vld [vmem:[%s3166_s1 + $0x54] ss:$8 sps:$4 sm:$0xff]   ;;  %2282 = vmatprep.subr.bf16.mxu1 %v2536_v12 }
   0xe   : > { %199 = vst [vmem:[#allocation2] sm:$0xff] %v2618_v4  ;;  %200 = vst [vmem:[#allocation2 + $0x8] sm:$0x3] %v2618_v4  ;;  %361 = vmatprep.subr.bf16.mxu0 %v2511_v3  ;;  %s2141_s27 = sshll.u32 %s3191_s16, 5  ;;  %v2516_v7 = vld [vmem:[%s3166_s1 + $0x50] ss:$8 sps:$4 sm:$0xff]   ;;  %2283 = vmatpush3.bf16.msra.mxu1 %v2536_v12 }
   0xf   : > { %203 = vst [vmem:[#allocation2 + $0x20] sm:$0xff] %v2618_v4  ;;  %204 = vst [vmem:[#allocation2 + $0x28] sm:$0x3] %v2618_v4  ;;  %v2517_v8 = vld [vmem:[%s3166_s1 + $0x44] ss:$8 sps:$4 sm:$0xff]   ;;  %s2702_s8 = scalar_lea.vmem %s3165_s0, %s2141_s27  ;;  %v2538_v14 = vld [vmem:[%s3168_s3 + $0x30] sm:$0xff]   ;;  %s197_s17 = scalar_lea.vmem %s3169_s4, %s2141_s27 }
  0x10   : > { %205 = vst [vmem:[#allocation2 + $0x30] sm:$0xff] %v2618_v4  ;;  %206 = vst [vmem:[#allocation2 + $0x38] sm:$0x3] %v2618_v4  ;;  %v2519_v9 = vld [vmem:[%s3166_s1 + $0x40] ss:$8 sps:$4 sm:$0xff]   ;;  %2284 = vmatprep.subr.bf16.mxu1 %v2538_v14  ;;  %v2537_v21 = vld [vmem:[%s3168_s3 + $0x78] sm:$0xff]  }
  0x11   : > { %207 = vst [vmem:[#allocation2 + $0x40] sm:$0xff] %v2618_v4  ;;  %208 = vst [vmem:[#allocation2 + $0x48] sm:$0x3] %v2618_v4  ;;  %362 = vmatpush1.bf16.msra.mxu0 %v2513_v5  ;;  %v2520_v10 = vld [vmem:[%s3166_s1 + $0x34] ss:$8 sps:$4 sm:$0xff]   ;;  %v2540_v16 = vld [vmem:[%s3168_s3 + $0x28] sm:$0xff]  }
  0x12   : > { %209 = vst [vmem:[#allocation2 + $0x50] sm:$0xff] %v2618_v4  ;;  %210 = vst [vmem:[#allocation2 + $0x58] sm:$0x3] %v2618_v4  ;;  %363 = vmatprep.subr.bf16.mxu0 %v2514_v6  ;;  %v2522_v11 = vld [vmem:[%s3166_s1 + $0x30] ss:$8 sps:$4 sm:$0xff]   ;;  %2285 = vmatpush3.bf16.msra.mxu1 %v2538_v14  ;;  %v2532_v22 = vld [vmem:[%s2702_s8] sm:$0xff]  }
  0x13   : > { %211 = vst [vmem:[#allocation2 + $0x60] sm:$0xff] %v2618_v4  ;;  %212 = vst [vmem:[#allocation2 + $0x68] sm:$0x3] %v2618_v4  ;;  %v2523_v13 = vld [vmem:[%s3166_s1 + $0x24] ss:$8 sps:$4 sm:$0xff]   ;;  %2286 = vmatprep.subr.bf16.mxu1 %v2540_v16  ;;  %v2539_v23 = vld [vmem:[%s3168_s3 + $0x70] sm:$0xff]  }
  0x14   : > { %213 = vst [vmem:[#allocation2 + $0x70] sm:$0xff] %v2618_v4  ;;  %214 = vst [vmem:[#allocation2 + $0x78] sm:$0x3] %v2618_v4  ;;  %v2525_v15 = vld [vmem:[%s3166_s1 + $0x20] ss:$8 sps:$4 sm:$0xff]   ;;  %v2534_v26 = vld [vmem:[%s2702_s8 + $0x10] sm:$0xff]  }
  0x15   : > { %215 = vst [vmem:[#allocation2 + $0x80] sm:$0xff] %v2618_v4  ;;  %216 = vst [vmem:[#allocation2 + $0x88] sm:$0x3] %v2618_v4  ;;  %364 = vmatpush1.bf16.msra.mxu0 %v2516_v7  ;;  %v2526_v17 = vld [vmem:[%s3166_s1 + $0x14] ss:$8 sps:$4 sm:$0xff]   ;;  %v2541_v24 = vld [vmem:[%s3168_s3 + $0x68] sm:$0xff]  }
  0x16   : > { %217 = vst [vmem:[#allocation2 + $0x90] sm:$0xff] %v2618_v4  ;;  %218 = vst [vmem:[#allocation2 + $0x98] sm:$0x3] %v2618_v4  ;;  %365 = vmatprep.subr.bf16.mxu0 %v2517_v8  ;;  %v2528_v18 = vld [vmem:[%s3166_s1 + $0x10] ss:$8 sps:$4 sm:$0xff]   ;;  %2287 = vmatpush3.bf16.msra.mxu1 %v2540_v16  ;;  %v2533_v25 = vld [vmem:[%s2702_s8 + $0x8] sm:$0xff]  }
  0x17   : > { %v2529_v19 = vld [vmem:[%s3166_s1 + $0x4] ss:$8 sps:$4 sm:$0xff]   ;;  %v2531_v20 = vld [vmem:[%s3166_s1] ss:$8 sps:$4 sm:$0xff]   ;;  %v2535_v27 = vld [vmem:[%s2702_s8 + $0x18] sm:$0xff]   ;;  %v246_v41 = vshrl.u32 %v245_v40, 7 }
  0x18   : > { %v2543_v28 = vld [vmem:[%s3168_s3 + $0x60] sm:$0xff]   ;;  %v2545_v29 = vld [vmem:[%s3168_s3 + $0x58] sm:$0xff]   ;;  %v2547_v31 = vld [vmem:[%s3168_s3 + $0x50] sm:$0xff]  }
  0x19   : > { %366 = vmatpush1.bf16.msra.mxu0 %v2519_v9  ;;  %v2542_v30 = vld [vmem:[%s3168_s3 + $0x20] sm:$0xff]   ;;  %v2544_v32 = vld [vmem:[%s3168_s3 + $0x18] sm:$0xff]   ;;  %v2549_v33 = vld [vmem:[%s3168_s3 + $0x48] sm:$0xff]   ;;  %v247_v42 = vsub.s32 0, %v246_v41  ;;  %v251_v44 = vsub.s32 1, %v246_v41 }
  0x1a   : > { %367 = vmatprep.subr.bf16.mxu0 %v2520_v10  ;;  %2288 = vmatprep.subr.bf16.mxu1 %v2542_v30  ;;  %v2546_v34 = vld [vmem:[%s3168_s3 + $0x10] sm:$0xff]   ;;  %v2551_v35 = vld [vmem:[%s3168_s3 + $0x40] sm:$0xff]   ;;  %v2548_v36 = vld [vmem:[%s3168_s3 + $0x8] sm:$0xff]  }
  0x1b   : > { %2289 = vmatpush3.bf16.msra.mxu1 %v2542_v30  ;;  %v2553_v37 = vld [vmem:[%s3168_s3 + $0xf8] sm:$0xff]   ;;  %v2550_v38 = vld [vmem:[%s3168_s3] sm:$0xff]   ;;  %v2555_v6 = vld [vmem:[%s3168_s3 + $0xf0] sm:$0xff]  }
  0x1c   : > { %2290 = vmatprep.subr.bf16.mxu1 %v2544_v32  ;;  %v2792_v39 = vld [vmem:[%s3168_s3 + $0xb8] sm:$0xff]   ;;  %v243_v43 = vld [vmem:[%s3167_s2] sm:$0x3]  ;;  %v2563_v41 = vld [vmem:[%s3168_s3 + $0xd0] sm:$0xff]  }
  0x1d   : > { %368 = vmatpush1.bf16.msra.mxu0 %v2522_v11  ;;  %v2798_v45 = vrot.slane %v243_v43, %v247_v42  ;;  %v2800_v46 = vrot.slane %v243_v43, %v251_v44  ;;  %v598_v50 = vld [vmem:[#allocation2 + $0x1] sm:$0xff]  ;;  %v2561_v30 = vld [vmem:[%s3168_s3 + $0xd8] sm:$0xff]  }
  0x1e   : > { %369 = vmatprep.subr.bf16.mxu0 %v2523_v13  ;;  %v2557_v11 = vld [vmem:[%s3168_s3 + $0xe8] sm:$0xff]   ;;  %v2560_v44 = vld [vmem:[%s3168_s3 + $0x98] sm:$0xff]  }
  0x1f   : > { %2291 = vmatpush3.bf16.msra.mxu1 %v2544_v32 }
  0x20   : > { %2292 = vmatprep.subr.bf16.mxu1 %v2546_v34 }
  0x21   : > { %370 = vmatpush1.bf16.msra.mxu0 %v2525_v15 }
  0x22   : > { %371 = vmatprep.subr.bf16.mxu0 %v2526_v17 }
  0x23   : > { %2293 = vmatpush3.bf16.msra.mxu1 %v2546_v34 }
  0x24   : > { %2294 = vmatprep.subr.bf16.mxu1 %v2548_v36 }
  0x25   : > { %372 = vmatpush1.bf16.msra.mxu0 %v2528_v18 }
  0x26   : > { %373 = vmatprep.subr.bf16.mxu0 %v2529_v19 }
  0x27   : > { %2295 = vmatpush3.bf16.msra.mxu1 %v2548_v36 }
  0x28   : > { %2296 = vmatprep.subr.bf16.mxu1 %v2550_v38 }
  0x29   : > { %374 = vmatpush1.bf16.msra.mxu0 %v2531_v20 }
  0x2a   : > { %2306 = vmatprep.subr.bf16.mxu0 %v2537_v21 }
  0x2b   : > { %2297 = vmatpush3.bf16.msra.mxu1 %v2550_v38 }
  0x2c   : > { %392 = vmatmul.mubr.bf16.vlgmr.msra.gmra.mxu0 %v2532_v22  ;;  %2330 = vmatprep.subr.bf16.mxu1 %v2792_v39 }
  0x2d   : > { %401 = vmatprep.mubr.bf16.mxu0 %v2617_v2  ;;  %2307 = vmatpush3.bf16.msra.mxu0 %v2537_v21  ;;  %v2554_v21 = vld [vmem:[%s3168_s3 + $0xb0] sm:$0xff]  }
  0x2e   : > { %2308 = vmatprep.subr.bf16.mxu0 %v2539_v23 }
  0x31   : > { %2309 = vmatpush3.bf16.msra.mxu0 %v2539_v23  ;;  %v2559_v23 = vld [vmem:[%s3168_s3 + $0xe0] sm:$0xff]  }
  0x32   : > { %2310 = vmatprep.subr.bf16.mxu0 %v2541_v24 }
  0x34   : > { %402 = vmatmul.mubr.bf16.gmra.mxu0 %v2533_v25 }
  0x35   : > { %411 = vmatprep.mubr.bf16.mxu0 %v2617_v2  ;;  %2311 = vmatpush3.bf16.msra.mxu0 %v2541_v24 }
  0x36   : > { %2312 = vmatprep.subr.bf16.mxu0 %v2543_v28 }
  0x39   : > { %2313 = vmatpush3.bf16.msra.mxu0 %v2543_v28 }
  0x3a   : > { %2314 = vmatprep.subr.bf16.mxu0 %v2545_v29 }
  0x3c   : > { %412 = vmatmul.mubr.bf16.gmra.mxu0 %v2534_v26 }
  0x3d   : > { %421 = vmatprep.mubr.bf16.mxu0 %v2617_v2  ;;  %2315 = vmatpush3.bf16.msra.mxu0 %v2545_v29  ;;  %v2556_v29 = vld [vmem:[%s3168_s3 + $0xa8] sm:$0xff]  }
  0x3e   : > { %2316 = vmatprep.subr.bf16.mxu0 %v2547_v31 }
  0x41   : > { %2317 = vmatpush3.bf16.msra.mxu0 %v2547_v31 }
  0x42   : > { %2318 = vmatprep.subr.bf16.mxu0 %v2549_v33 }
  0x44   : > { %422 = vmatmul.mubr.bf16.gmra.mxu0 %v2535_v27 }
  0x45   : > { %2319 = vmatpush3.bf16.msra.mxu0 %v2549_v33 }
  0x46   : > { %2320 = vmatprep.subr.bf16.mxu0 %v2551_v35 }
  0x49   : > { %2321 = vmatpush3.bf16.msra.mxu0 %v2551_v35 }
  0x4a   : > { %2354 = vmatprep.subr.bf16.mxu0 %v2553_v37 }
  0xec   : > { %v393_v47 = vpop.f32.mrf.mxu0 }
  0xed   : > { %v394_v48 = vadd.f32 %v393_v47, %v2798_v45 }
  0xee   : > { %v395_v49 = vpop.f32.mrf.mxu0 }
  0xef   : > { %v2803_v51 = vmax.f32 %v394_v48, 0.0  ;;  %v2806_v52 = vadd.f32 %v395_v49, %v2800_v46  ;;  %v748_v48 = vld [vmem:[#allocation2 + $0x2] sm:$0xff] }
  0xf0   : > { %v397_v53 = vpop.f32.mrf.mxu0 }
  0xf1   : > { %441 = vst [vmem:[#allocation2 + $0x11] sm:$0xff] %v2803_v51  ;;  %v398_v54 = vadd.f32 %v397_v53, %v2798_v45  ;;  %v606_v55 = vpack.c.bf16 %v2803_v51, %v598_v50 }
  0xf2   : > { %v399_v56 = vpop.f32.mrf.mxu0 }
  0xf3   : > { %v2811_v57 = vmax.f32 %v398_v54, 0.0  ;;  %v2814_v58 = vadd.f32 %v399_v56, %v2800_v46  ;;  %2322 = vmatprep.mubr.bf16.mxu0 %v606_v55  ;;  %v2562_v54 = vld [vmem:[%s3168_s3 + $0x90] sm:$0xff]   ;;  %v2567_v56 = vld [vmem:[%s3168_s3 + $0xc0] sm:$0xff]  }
  0xf4   : > { %v403_v59 = vpop.f32.mrf.mxu0 }
  0xf5   : > { %442 = vst [vmem:[#allocation2 + $0x21] sm:$0xff] %v2811_v57  ;;  %v404_v60 = vadd.f32 %v403_v59, %v2798_v45  ;;  %v2564_v59 = vld [vmem:[%s3168_s3 + $0x88] sm:$0xff]  }
  0xf6   : > { %v405_v61 = vpop.f32.mrf.mxu0 }
  0xf7   : > { %v2818_v62 = vmax.f32 %v404_v60, 0.0  ;;  %v2821_v63 = vadd.f32 %v405_v61, %v2800_v46  ;;  %v2569_v60 = vld [vmem:[%s3168_s3 + $0x178] sm:$0xff]   ;;  %v2566_v61 = vld [vmem:[%s3168_s3 + $0x80] sm:$0xff]  }
  0xf8   : > { %v407_v0 = vpop.f32.mrf.mxu0  ;;  %v2823_v1 = vld [vmem:[#allocation2 + $0x10] sm:$0xff] }
  0xf9   : > { %443 = vst [vmem:[#allocation2 + $0x31] sm:$0xff] %v2818_v62  ;;  %v408_v2 = vadd.f32 %v407_v0, %v2798_v45  ;;  %v457_v3 = vpack.c.bf16 %v2823_v1, %v2618_v4  ;;  %v2831_v5 = vpack.c.bf16 %v2818_v62, %v2811_v57  ;;  %v749_v49 = vld [vmem:[#allocation2 + $0x12] sm:$0xff] }
  0xfa   : > { %v409_v7 = vpop.f32.mrf.mxu0  ;;  %v756_v55 = vpack.c.bf16 %v749_v49, %v748_v48  ;;  %v2584_v48 = vld [vmem:[%s3168_s3 + $0x1b8] sm:$0xff]  }
  0xfb   : > { %v2836_v8 = vmax.f32 %v408_v2, 0.0  ;;  %v2839_v9 = vadd.f32 %v409_v7, %v2800_v46  ;;  %2298 = vmatprep.mubr.bf16.mxu1 %v457_v3  ;;  %2323 = vmatmul.mubr.bf16.vlgmr.msra.gmra.mxu0 %v2831_v5  ;;  %v2571_v2 = vld [vmem:[%s3168_s3 + $0x170] sm:$0xff]   ;;  %v2568_v3 = vld [vmem:[%s3168_s3 + $0x138] sm:$0xff]  }
  0xfc   : > { %v413_v10 = vpop.f32.mrf.mxu0  ;;  %2355 = vmatpush3.bf16.msra.mxu0 %v2553_v37  ;;  %v451_v17 = vld [vmem:[#allocation2 + $0x20] sm:$0xff] }
  0xfd   : > { %444 = vst [vmem:[#allocation2 + $0x41] sm:$0xff] %v2836_v8  ;;  %v414_v4 = vadd.f32 %v413_v10, %v2798_v45  ;;  %2356 = vmatprep.subr.bf16.mxu0 %v2555_v6  ;;  %v1057_v12 = vpack.c.bf16 %v2836_v8, %v2818_v62  ;;  %v906_v43 = vpack.c.bf16 %v451_v17, %v2823_v1  ;;  %v2573_v10 = vld [vmem:[%s3168_s3 + $0x168] sm:$0xff]   ;;  %v2593_v62 = vld [vmem:[%s3168_s3 + $0x1d8] sm:$0xff]  }
  0xfe   : > { %v415_v13 = vpop.f32.mrf.mxu0 }
  0xff   : > { %v2849_v14 = vmax.f32 %v414_v4, 0.0  ;;  %v2852_v15 = vadd.f32 %v415_v13, %v2800_v46  ;;  %v750_v4 = vld [vmem:[#allocation2 + $0x22] sm:$0xff] }
 0x100   : > { %v417_v16 = vpop.f32.mrf.mxu0  ;;  %v2854_v18 = vld [vmem:[#allocation2 + $0x30] sm:$0xff]  ;;  %2357 = vmatpush3.bf16.msra.mxu0 %v2555_v6 }
 0x101   : > { %445 = vst [vmem:[#allocation2 + $0x51] sm:$0xff] %v2849_v14  ;;  %v418_v19 = vadd.f32 %v417_v16, %v2798_v45  ;;  %v2859_v20 = vpack.c.bf16 %v2854_v18, %v451_v17  ;;  %2358 = vmatprep.subr.bf16.mxu0 %v2557_v11  ;;  %v2866_v22 = vpack.c.bf16 %v2849_v14, %v2836_v8  ;;  %v2943_v6 = vld [vmem:[#allocation2 + $0x32] sm:$0xff] }
 0x102   : > { %v419_v24 = vpop.f32.mrf.mxu0  ;;  %v2953_v13 = vpack.c.bf16 %v2943_v6, %v750_v4  ;;  %v2570_v17 = vld [vmem:[%s3168_s3 + $0x130] sm:$0xff]  }
 0x103   : > { %v2871_v25 = vmax.f32 %v418_v19, 0.0  ;;  %v2874_v26 = vadd.f32 %v419_v24, %v2800_v46  ;;  %2299 = vmatmul.mubr.bf16.vlgmr.msra.gmra.mxu1 %v2859_v20  ;;  %2326 = vmatprep.mubr.bf16.mxu0 %v2866_v22  ;;  %v2572_v24 = vld [vmem:[%s3168_s3 + $0x128] sm:$0xff]  }
 0x104   : > { %2331 = vmatpush3.bf16.msra.mxu1 %v2792_v39  ;;  %v423_v27 = vpop.f32.mrf.mxu0  ;;  %2359 = vmatpush3.bf16.msra.mxu0 %v2557_v11  ;;  %v453_v35 = vld [vmem:[#allocation2 + $0x40] sm:$0xff] }
 0x105   : > { %446 = vst [vmem:[#allocation2 + $0x61] sm:$0xff] %v2871_v25  ;;  %v424_v28 = vadd.f32 %v423_v27, %v2798_v45  ;;  %2332 = vmatprep.subr.bf16.mxu1 %v2554_v21  ;;  %2360 = vmatprep.subr.bf16.mxu0 %v2559_v23  ;;  %v2558_v39 = vld [vmem:[%s3168_s3 + $0xa0] sm:$0xff]   ;;  %v907_v0 = vpack.c.bf16 %v453_v35, %v2854_v18 }
 0x106   : > { %v425_v31 = vpop.f32.mrf.mxu0  ;;  %v752_v16 = vld [vmem:[#allocation2 + $0x42] sm:$0xff] }
 0x107   : > { %v2887_v32 = vmax.f32 %v424_v28, 0.0  ;;  %v2890_v33 = vadd.f32 %v425_v31, %v2800_v46  ;;  %v2574_v31 = vld [vmem:[%s3168_s3 + $0x120] sm:$0xff]  }
 0x108   : > { %2333 = vmatpush3.bf16.msra.mxu1 %v2554_v21  ;;  %v427_v34 = vpop.f32.mrf.mxu0  ;;  %v454_v36 = vld [vmem:[#allocation2 + $0x50] sm:$0xff]  ;;  %2361 = vmatpush3.bf16.msra.mxu0 %v2559_v23  ;;  %v2575_v21 = vld [vmem:[%s3168_s3 + $0x160] sm:$0xff]   ;;  %v1206_v23 = vpack.c.bf16 %v750_v4, %v749_v49  ;;  %v2589_v49 = vld [vmem:[%s3168_s3 + $0x1e8] sm:$0xff]  }
 0x109   : > { %447 = vst [vmem:[#allocation2 + $0x71] sm:$0xff] %v2887_v32  ;;  %v428_v37 = vadd.f32 %v427_v34, %v2798_v45  ;;  %2334 = vmatprep.subr.bf16.mxu1 %v2556_v29  ;;  %v2894_v38 = vpack.c.bf16 %v454_v36, %v453_v35  ;;  %2362 = vmatprep.subr.bf16.mxu0 %v2561_v30  ;;  %v2565_v45 = vld [vmem:[%s3168_s3 + $0xc8] sm:$0xff]   ;;  %v2945_v7 = vld [vmem:[#allocation2 + $0x52] sm:$0xff]  ;;  %v2607_v4 = vld [vmem:[%s3168_s3 + $0x200] sm:$0xff]  }
 0x10a   : > { %v2901_v40 = vpack.c.bf16 %v2887_v32, %v2871_v25  ;;  %v2959_v18 = vpack.c.bf16 %v2945_v7, %v752_v16  ;;  %v1056_v34 = vpack.c.bf16 %v2811_v57, %v2803_v51  ;;  %v2579_v35 = vld [vmem:[%s3168_s3 + $0x150] sm:$0xff]   ;;  %v2581_v51 = vld [vmem:[%s3168_s3 + $0x148] sm:$0xff]  }
 0x10b   : > { %v2906_v42 = vmax.f32 %v428_v37, 0.0  ;;  %2302 = vmatprep.mubr.bf16.mxu1 %v2894_v38  ;;  %v2578_v57 = vld [vmem:[%s3168_s3 + $0x110] sm:$0xff]   ;;  %v2583_v37 = vld [vmem:[%s3168_s3 + $0x140] sm:$0xff]  }
 0x10c   : > { %2327 = vmatmul.mubr.bf16.gmra.mxu0 %v2901_v40  ;;  %2335 = vmatpush3.bf16.msra.mxu1 %v2556_v29  ;;  %v455_v47 = vld [vmem:[#allocation2 + $0x60] sm:$0xff]  ;;  %v2577_v29 = vld [vmem:[%s3168_s3 + $0x158] sm:$0xff]  }
 0x10d   : > { %2363 = vmatpush3.bf16.msra.mxu0 %v2561_v30  ;;  %448 = vst [vmem:[#allocation2 + $0x81] sm:$0xff] %v2906_v42  ;;  %2336 = vmatprep.subr.bf16.mxu1 %v2558_v39  ;;  %v908_v1 = vpack.c.bf16 %v455_v47, %v454_v36  ;;  %v754_v27 = vld [vmem:[#allocation2 + $0x62] sm:$0xff]  ;;  %v2576_v36 = vld [vmem:[%s3168_s3 + $0x118] sm:$0xff]   ;;  %v1059_v8 = vpack.c.bf16 %v2906_v42, %v2887_v32 }
 0x10e   : > { %2370 = vmatprep.mubr.bf16.mxu0 %v906_v43  ;;  %2364 = vmatprep.subr.bf16.mxu0 %v2563_v41  ;;  %v2582_v43 = vld [vmem:[%s3168_s3 + $0x100] sm:$0xff]   ;;  %v2597_v32 = vld [vmem:[%s3168_s3 + $0x1c8] sm:$0xff]  }
 0x110   : > { %2337 = vmatpush3.bf16.msra.mxu1 %v2558_v39  ;;  %v456_v50 = vld [vmem:[#allocation2 + $0x70] sm:$0xff]  ;;  %v2580_v39 = vld [vmem:[%s3168_s3 + $0x108] sm:$0xff]  }
 0x111   : > { %2365 = vmatpush3.bf16.msra.mxu0 %v2563_v41  ;;  %2338 = vmatprep.subr.bf16.mxu1 %v2560_v44  ;;  %v2918_v53 = vpack.c.bf16 %v456_v50, %v455_v47  ;;  %v755_v28 = vld [vmem:[#allocation2 + $0x72] sm:$0xff]  ;;  %v1208_v47 = vpack.c.bf16 %v754_v27, %v2945_v7 }
 0x112   : > { %2366 = vmatprep.subr.bf16.mxu0 %v2565_v45  ;;  %v2973_v30 = vpack.c.bf16 %v755_v28, %v754_v27  ;;  %v2585_v41 = vld [vmem:[%s3168_s3 + $0x1f8] sm:$0xff]  }
 0x113   : > { %2303 = vmatmul.mubr.bf16.gmra.mxu1 %v2918_v53 }
 0x114   : > { %2339 = vmatpush3.bf16.msra.mxu1 %v2560_v44  ;;  %2346 = vmatprep.mubr.bf16.mxu1 %v756_v55  ;;  %v2950_v11 = vld [vmem:[#allocation2 + $0x80] sm:$0xff]  ;;  %v1207_v44 = vpack.c.bf16 %v752_v16, %v2943_v6  ;;  %v1058_v55 = vpack.c.bf16 %v2871_v25, %v2849_v14  ;;  %v2588_v14 = vld [vmem:[%s3168_s3 + $0x1a8] sm:$0xff]   ;;  %v2592_v25 = vld [vmem:[%s3168_s3 + $0x198] sm:$0xff]  }
 0x115   : > { %2340 = vmatprep.subr.bf16.mxu1 %v2562_v54  ;;  %2367 = vmatpush3.bf16.msra.mxu0 %v2565_v45  ;;  %v909_v19 = vpack.c.bf16 %v2950_v11, %v456_v50  ;;  %v2587_v45 = vld [vmem:[%s3168_s3 + $0x1f0] sm:$0xff]   ;;  %v3016_v50 = vld [vmem:[#allocation2 + $0x82] sm:$0xff] }
 0x116   : > { %2368 = vmatprep.subr.bf16.mxu0 %v2567_v56 }
 0x118   : > { %2341 = vmatpush3.bf16.msra.mxu1 %v2562_v54  ;;  %v2586_v54 = vld [vmem:[%s3168_s3 + $0x1b0] sm:$0xff]  }
 0x119   : > { %2342 = vmatprep.subr.bf16.mxu1 %v2564_v59  ;;  %2369 = vmatpush3.bf16.msra.mxu0 %v2567_v56  ;;  %v1209_v56 = vpack.c.bf16 %v3016_v50, %v755_v28 }
 0x11a   : > { %2402 = vmatprep.subr.bf16.mxu0 %v2569_v60 }
 0x11c   : > { %2343 = vmatpush3.bf16.msra.mxu1 %v2564_v59  ;;  %2371 = vmatmul.mubr.bf16.vlgmr.msra.gmra.mxu0 %v907_v0  ;;  %v2591_v59 = vld [vmem:[%s3168_s3 + $0x1e0] sm:$0xff]  }
 0x11d   : > { %2344 = vmatprep.subr.bf16.mxu1 %v2566_v61  ;;  %2374 = vmatprep.mubr.bf16.mxu0 %v908_v1  ;;  %v2598_v0 = vld [vmem:[%s3168_s3 + $0x180] sm:$0xff]   ;;  %v2600_v1 = vld [vmem:[%s3168_s3 + $0x238] sm:$0xff]  }
 0x11e   : > { %2403 = vmatpush3.bf16.msra.mxu0 %v2569_v60  ;;  %v2594_v60 = vld [vmem:[%s3168_s3 + $0x190] sm:$0xff]  }
 0x11f   : > { %2404 = vmatprep.subr.bf16.mxu0 %v2571_v2 }
 0x120   : > { %2345 = vmatpush3.bf16.msra.mxu1 %v2566_v61  ;;  %v2596_v61 = vld [vmem:[%s3168_s3 + $0x188] sm:$0xff]  }
 0x121   : > { %2378 = vmatprep.subr.bf16.mxu1 %v2568_v3 }
 0x122   : > { %2405 = vmatpush3.bf16.msra.mxu0 %v2571_v2  ;;  %v1506_v2 = vld [vmem:[#allocation2 + $0x91] sm:$0xff] }
 0x123   : > { %2347 = vmatmul.mubr.bf16.vlgmr.msra.gmra.mxu1 %v2953_v13  ;;  %2406 = vmatprep.subr.bf16.mxu0 %v2573_v10  ;;  %v1510_v6 = vpack.c.bf16 %v1506_v2, %v2906_v42  ;;  %v2604_v42 = vld [vmem:[%s3168_s3 + $0x218] sm:$0xff]  }
 0x124   : > { %2350 = vmatprep.mubr.bf16.mxu1 %v2959_v18  ;;  %2379 = vmatpush3.bf16.msra.mxu1 %v2568_v3  ;;  %v2601_v3 = vld [vmem:[%s3168_s3 + $0x230] sm:$0xff]  }
 0x125   : > { %2380 = vmatprep.subr.bf16.mxu1 %v2570_v17  ;;  %2375 = vmatmul.mubr.bf16.gmra.mxu0 %v909_v19 }
 0x126   : > { %2407 = vmatpush3.bf16.msra.mxu0 %v2573_v10  ;;  %2418 = vmatprep.mubr.bf16.mxu0 %v1206_v23  ;;  %v2606_v10 = vld [vmem:[%s3168_s3 + $0x208] sm:$0xff]  }
 0x127   : > { %2408 = vmatprep.subr.bf16.mxu0 %v2575_v21 }
 0x128   : > { %2381 = vmatpush3.bf16.msra.mxu1 %v2570_v17 }
 0x129   : > { %2382 = vmatprep.subr.bf16.mxu1 %v2572_v24 }
 0x12a   : > { %2409 = vmatpush3.bf16.msra.mxu0 %v2575_v21  ;;  %v429_v21 = vpop.f32.mrf.mxu0 }
 0x12b   : > { %2351 = vmatmul.mubr.bf16.gmra.mxu1 %v2973_v30  ;;  %2410 = vmatprep.subr.bf16.mxu0 %v2577_v29 }
 0x12c   : > { %2383 = vmatpush3.bf16.msra.mxu1 %v2572_v24  ;;  %2394 = vmatprep.mubr.bf16.mxu1 %v1056_v34 }
 0x12d   : > { %2384 = vmatprep.subr.bf16.mxu1 %v2574_v31 }
 0x12e   : > { %2411 = vmatpush3.bf16.msra.mxu0 %v2577_v29 }
 0x12f   : > { %2412 = vmatprep.subr.bf16.mxu0 %v2579_v35 }
 0x130   : > { %2385 = vmatpush3.bf16.msra.mxu1 %v2574_v31 }
 0x131   : > { %2386 = vmatprep.subr.bf16.mxu1 %v2576_v36 }
 0x132   : > { %2413 = vmatpush3.bf16.msra.mxu0 %v2579_v35 }
 0x133   : > { %2414 = vmatprep.subr.bf16.mxu0 %v2581_v51 }
 0x134   : > { %2387 = vmatpush3.bf16.msra.mxu1 %v2576_v36 }
 0x135   : > { %2388 = vmatprep.subr.bf16.mxu1 %v2578_v57 }
 0x136   : > { %2415 = vmatpush3.bf16.msra.mxu0 %v2581_v51 }
 0x137   : > { %2416 = vmatprep.subr.bf16.mxu0 %v2583_v37 }
 0x138   : > { %2389 = vmatpush3.bf16.msra.mxu1 %v2578_v57 }
 0x139   : > { %2390 = vmatprep.subr.bf16.mxu1 %v2580_v39 }
 0x13a   : > { %2417 = vmatpush3.bf16.msra.mxu0 %v2583_v37 }
 0x13b   : > { %2450 = vmatprep.subr.bf16.mxu0 %v2585_v41 }
 0x13c   : > { %2391 = vmatpush3.bf16.msra.mxu1 %v2580_v39 }
 0x13d   : > { %2392 = vmatprep.subr.bf16.mxu1 %v2582_v43  ;;  %2419 = vmatmul.mubr.bf16.vlgmr.msra.gmra.mxu0 %v1207_v44 }
 0x13e   : > { %2422 = vmatprep.mubr.bf16.mxu0 %v1208_v47  ;;  %2451 = vmatpush3.bf16.msra.mxu0 %v2585_v41 }
 0x13f   : > { %2452 = vmatprep.subr.bf16.mxu0 %v2587_v45 }
 0x140   : > { %2393 = vmatpush3.bf16.msra.mxu1 %v2582_v43 }
 0x141   : > { %2426 = vmatprep.subr.bf16.mxu1 %v2584_v48 }
 0x142   : > { %2453 = vmatpush3.bf16.msra.mxu0 %v2587_v45 }
 0x143   : > { %2395 = vmatmul.mubr.bf16.vlgmr.msra.gmra.mxu1 %v1057_v12  ;;  %2454 = vmatprep.subr.bf16.mxu0 %v2589_v49  ;;  %v2590_v12 = vld [vmem:[%s3168_s3 + $0x1a0] sm:$0xff]  }
 0x144   : > { %2398 = vmatprep.mubr.bf16.mxu1 %v1058_v55  ;;  %2427 = vmatpush3.bf16.msra.mxu1 %v2584_v48 }
 0x145   : > { %2428 = vmatprep.subr.bf16.mxu1 %v2586_v54  ;;  %2423 = vmatmul.mubr.bf16.gmra.mxu0 %v1209_v56 }
 0x146   : > { %2455 = vmatpush3.bf16.msra.mxu0 %v2589_v49  ;;  %2466 = vmatprep.mubr.bf16.mxu0 %v2831_v5  ;;  %v2595_v5 = vld [vmem:[%s3168_s3 + $0x1d0] sm:$0xff]  }
 0x147   : > { %2456 = vmatprep.subr.bf16.mxu0 %v2591_v59 }
 0x148   : > { %2429 = vmatpush3.bf16.msra.mxu1 %v2586_v54 }
 0x149   : > { %2430 = vmatprep.subr.bf16.mxu1 %v2588_v14 }
 0x14a   : > { %2457 = vmatpush3.bf16.msra.mxu0 %v2591_v59 }
 0x14b   : > { %2399 = vmatmul.mubr.bf16.gmra.mxu1 %v1059_v8  ;;  %2458 = vmatprep.subr.bf16.mxu0 %v2593_v62 }
 0x14c   : > { %2431 = vmatpush3.bf16.msra.mxu1 %v2588_v14  ;;  %2442 = vmatprep.mubr.bf16.mxu1 %v2859_v20  ;;  %v2599_v20 = vld [vmem:[%s3168_s3 + $0x1c0] sm:$0xff]  }
 0x14d   : > { %2432 = vmatprep.subr.bf16.mxu1 %v2590_v12 }
 0x14e   : > { %2459 = vmatpush3.bf16.msra.mxu0 %v2593_v62 }
 0x14f   : > { %2460 = vmatprep.subr.bf16.mxu0 %v2595_v5 }
 0x150   : > { %2433 = vmatpush3.bf16.msra.mxu1 %v2590_v12 }
 0x151   : > { %2434 = vmatprep.subr.bf16.mxu1 %v2592_v25 }
 0x152   : > { %2461 = vmatpush3.bf16.msra.mxu0 %v2595_v5 }
 0x153   : > { %2462 = vmatprep.subr.bf16.mxu0 %v2597_v32 }
 0x154   : > { %2435 = vmatpush3.bf16.msra.mxu1 %v2592_v25 }
 0x155   : > { %2436 = vmatprep.subr.bf16.mxu1 %v2594_v60 }
 0x156   : > { %2463 = vmatpush3.bf16.msra.mxu0 %v2597_v32 }
 0x157   : > { %2464 = vmatprep.subr.bf16.mxu0 %v2599_v20 }
 0x158   : > { %2437 = vmatpush3.bf16.msra.mxu1 %v2594_v60 }
 0x159   : > { %2438 = vmatprep.subr.bf16.mxu1 %v2596_v61 }
 0x15a   : > { %2465 = vmatpush3.bf16.msra.mxu0 %v2599_v20 }
 0x15c   : > { %2439 = vmatpush3.bf16.msra.mxu1 %v2596_v61 }
 0x15d   : > { %2440 = vmatprep.subr.bf16.mxu1 %v2598_v0  ;;  %2467 = vmatmul.mubr.bf16.vlgmr.msra.gmra.mxu0 %v2866_v22  ;;  %v2602_v22 = vld [vmem:[%s3168_s3 + $0x228] sm:$0xff]  }
 0x15e   : > { %2470 = vmatprep.mubr.bf16.mxu0 %v2901_v40  ;;  %v2608_v40 = vld [vmem:[#allocation2] sm:$0xff] }
 0x15f   : > { %v1360_v7 = vpack.c.bf16 %v2608_v40, %v2950_v11  ;;  %v1656_v11 = vld [vmem:[#allocation2 + $0x92] sm:$0xff] }
 0x160   : > { %2441 = vmatpush3.bf16.msra.mxu1 %v2598_v0 }
 0x161   : > { %2474 = vmatprep.subr.bf16.mxu1 %v2600_v1 }
 0x163   : > { %2443 = vmatmul.mubr.bf16.vlgmr.msra.gmra.mxu1 %v2894_v38  ;;  %v2603_v38 = vld [vmem:[%s3168_s3 + $0x220] sm:$0xff]  }
 0x164   : > { %2446 = vmatprep.mubr.bf16.mxu1 %v2918_v53  ;;  %2475 = vmatpush3.bf16.msra.mxu1 %v2600_v1  ;;  %v2605_v53 = vld [vmem:[%s3168_s3 + $0x210] sm:$0xff]  }
 0x165   : > { %2476 = vmatprep.subr.bf16.mxu1 %v2601_v3  ;;  %2471 = vmatmul.mubr.bf16.gmra.mxu0 %v1510_v6 }
 0x168   : > { %2477 = vmatpush3.bf16.msra.mxu1 %v2601_v3 }
 0x169   : > { %2478 = vmatprep.subr.bf16.mxu1 %v2602_v22 }
 0x16b   : > { %2447 = vmatmul.mubr.bf16.gmra.mxu1 %v1360_v7 }
 0x16c   : > { %2479 = vmatpush3.bf16.msra.mxu1 %v2602_v22  ;;  %2490 = vmatprep.mubr.bf16.mxu1 %v2953_v13  ;;  %v1660_v13 = vpack.c.bf16 %v1656_v11, %v3016_v50 }
 0x16d   : > { %2480 = vmatprep.subr.bf16.mxu1 %v2603_v38 }
 0x170   : > { %2481 = vmatpush3.bf16.msra.mxu1 %v2603_v38 }
 0x171   : > { %2482 = vmatprep.subr.bf16.mxu1 %v2604_v42 }
 0x174   : > { %2483 = vmatpush3.bf16.msra.mxu1 %v2604_v42 }
 0x175   : > { %2484 = vmatprep.subr.bf16.mxu1 %v2605_v53 }
 0x178   : > { %2485 = vmatpush3.bf16.msra.mxu1 %v2605_v53 }
 0x179   : > { %2486 = vmatprep.subr.bf16.mxu1 %v2606_v10 }
 0x17c   : > { %2487 = vmatpush3.bf16.msra.mxu1 %v2606_v10 }
 0x17d   : > { %2488 = vmatprep.subr.bf16.mxu1 %v2607_v4 }
 0x180   : > { %2489 = vmatpush3.bf16.msra.mxu1 %v2607_v4 }
 0x183   : > { %2491 = vmatmul.mubr.bf16.vlgmr.msra.gmra.mxu1 %v2959_v18 }
 0x184   : > { %2494 = vmatprep.mubr.bf16.mxu1 %v2973_v30 }
 0x18b   : > { %2495 = vmatmul.mubr.bf16.gmra.mxu1 %v1660_v13 }
 0x1bb   : > { %v2324_v24 = vpop.f32.mrf.mxu0 }
 0x1bd   : > { %v709_v28 = vpop.f32.mrf.mxu0 }
 0x1bf   : > { %v2325_v31 = vpop.f32.mrf.mxu0 }
 0x1c1   : > { %v712_v35 = vpop.f32.mrf.mxu0 }
 0x1c3   : > { %v2300_v16 = vpop.f32.mrf.mxu1 }
 0x1c4   : > { %v592_v53 = vadd.f32 %v2300_v16, %v2821_v63 }
 0x1c5   : > { %v559_v17 = vpop.f32.mrf.mxu1 }
 0x1c6   : > { %v590_v10 = vadd.f32 %v559_v17, %v2806_v52 }
 0x1c7   : > { %v2301_v19 = vpop.f32.mrf.mxu1 }
 0x1c8   : > { %v593_v4 = vadd.f32 %v2301_v19, %v2839_v9 }
 0x1c9   : > { %v562_v23 = vpop.f32.mrf.mxu1 }
 0x1cc   : > { %v2328_v18 = vpop.f32.mrf.mxu0 }
 0x1ce   : > { %v3098_v30 = vpop.f32.mrf.mxu0 }
 0x1d0   : > { %v3100_v37 = vpop.f32.mrf.mxu0 }
 0x1d2   : > { %v3102_v41 = vpop.f32.mrf.mxu0 }
 0x1d3   : > { %v2304_v27 = vpop.f32.mrf.mxu1 }
 0x1d5   : > { %v575_v29 = vpop.f32.mrf.mxu1 }
 0x1d6   : > { %v594_v9 = vadd.f32 %v575_v29, %v2852_v15 }
 0x1d7   : > { %v2305_v34 = vpop.f32.mrf.mxu1 }
 0x1d9   : > { %v578_v36 = vpop.f32.mrf.mxu1 }
 0x1dc   : > { %v2372_v44 = vpop.f32.mrf.mxu0 }
 0x1de   : > { %v1009_v47 = vpop.f32.mrf.mxu0 }
 0x1e0   : > { %v2373_v49 = vpop.f32.mrf.mxu0 }
 0x1e2   : > { %v1012_v54 = vpop.f32.mrf.mxu0 }
 0x1e3   : > { %v2348_v51 = vpop.f32.mrf.mxu1 }
 0x1e5   : > { %v859_v57 = vpop.f32.mrf.mxu1  ;;  %v3110_v56 = vpop.f32.mrf.mxu0 }
 0x1e7   : > { %v2349_v39 = vpop.f32.mrf.mxu1  ;;  %v3112_v14 = vpop.f32.mrf.mxu0 }
 0x1e8   : > { %3170 = vst [vmem:[#allocation3_spill] sm:$0xff] %v3112_v14  ;;  %v430_v14 = vadd.f32 %v429_v21, %v2800_v46 }
 0x1e9   : > { %v862_v43 = vpop.f32.mrf.mxu1  ;;  %v3114_v8 = vpop.f32.mrf.mxu0 }
 0x1ea   : > { %3171 = vst [vmem:[#allocation4_spill] sm:$0xff] %v3114_v8  ;;  %v596_v8 = vadd.f32 %v2304_v27, %v2890_v33  ;;  %v597_v19 = vadd.f32 %v2305_v34, %v430_v14  ;;  %v744_v33 = vadd.f32 %v3098_v30, %v594_v9 }
 0x1eb   : > { %v2352_v45 = vpop.f32.mrf.mxu1  ;;  %v3116_v5 = vpop.f32.mrf.mxu0 }
 0x1ec   : > { %3172 = vst [vmem:[#allocation5_spill] sm:$0xff] %v3116_v5  ;;  %v743_v5 = vadd.f32 %v2325_v31, %v593_v4  ;;  %v747_v21 = vadd.f32 %v3100_v37, %v597_v19 }
 0x1ed   : > { %v3104_v48 = vpop.f32.mrf.mxu1 }
 0x1ee   : > { %v893_v52 = vadd.f32 %v2349_v39, %v743_v5  ;;  %v894_v34 = vadd.f32 %v3104_v48, %v744_v33 }
 0x1ef   : > { %v3106_v50 = vpop.f32.mrf.mxu1 }
 0x1f0   : > { %v1043_v31 = vadd.f32 %v2373_v49, %v893_v52  ;;  %v3180_v49 = vld [vmem:[#allocation3_spill] sm:$0xff] }
 0x1f1   : > { %v3108_v55 = vpop.f32.mrf.mxu1 }
 0x1fd   : > { %v2420_v32 = vpop.f32.mrf.mxu0 }
 0x1ff   : > { %v1309_v20 = vpop.f32.mrf.mxu0 }
 0x201   : > { %v2421_v0 = vpop.f32.mrf.mxu0 }
 0x203   : > { %v2396_v59 = vpop.f32.mrf.mxu1  ;;  %v1312_v2 = vpop.f32.mrf.mxu0 }
 0x205   : > { %v1159_v62 = vpop.f32.mrf.mxu1  ;;  %v3124_v6 = vpop.f32.mrf.mxu0 }
 0x206   : > { %3176 = vst [vmem:[#allocation9_spill] sm:$0xff] %v3124_v6 }
 0x207   : > { %v2397_v12 = vpop.f32.mrf.mxu1  ;;  %v3126_v40 = vpop.f32.mrf.mxu0 }
 0x208   : > { %3177 = vst [vmem:[#allocation10_spill] sm:$0xff] %v3126_v40  ;;  %v1193_v15 = vadd.f32 %v2397_v12, %v1043_v31 }
 0x209   : > { %v1162_v25 = vpop.f32.mrf.mxu1  ;;  %v3128_v38 = vpop.f32.mrf.mxu0 }
 0x20a   : > { %3178 = vst [vmem:[#allocation11_spill] sm:$0xff] %v3128_v38 }
 0x20b   : > { %v2400_v60 = vpop.f32.mrf.mxu1  ;;  %v3133_v11 = vpop.f32.mrf.mxu0 }
 0x20c   : > { %3179 = vst [vmem:[#allocation12_spill] sm:$0xff] %v3133_v11 }
 0x20d   : > { %v3118_v61 = vpop.f32.mrf.mxu1 }
 0x20e   : > { %3173 = vst [vmem:[#allocation6_spill] sm:$0xff] %v3118_v61  ;;  %v740_v61 = vadd.f32 %v709_v28, %v590_v10 }
 0x20f   : > { %v3120_v1 = vpop.f32.mrf.mxu1 }
 0x210   : > { %3174 = vst [vmem:[#allocation7_spill] sm:$0xff] %v3120_v1  ;;  %v742_v1 = vadd.f32 %v2324_v24, %v592_v53  ;;  %v890_v16 = vadd.f32 %v859_v57, %v740_v61  ;;  %v746_v53 = vadd.f32 %v2328_v18, %v596_v8 }
 0x211   : > { %v3122_v3 = vpop.f32.mrf.mxu1  ;;  %v3188_v9 = vld [vmem:[#allocation11_spill] sm:$0xff] }
 0x212   : > { %3175 = vst [vmem:[#allocation8_spill] sm:$0xff] %v3122_v3  ;;  %v591_v3 = vadd.f32 %v562_v23, %v2814_v58  ;;  %v892_v40 = vadd.f32 %v2348_v51, %v742_v1  ;;  %v595_v58 = vadd.f32 %v578_v36, %v2874_v26  ;;  %v1040_v28 = vadd.f32 %v1009_v47, %v890_v16 }
 0x213   : > { %v896_v27 = vadd.f32 %v2352_v45, %v746_v53  ;;  %v897_v26 = vadd.f32 %v3106_v50, %v747_v21  ;;  %v1343_v47 = vadd.f32 %v2421_v0, %v1193_v15  ;;  %v3182_v50 = vld [vmem:[#allocation5_spill] sm:$0xff] }
 0x214   : > { %v741_v63 = vadd.f32 %v712_v35, %v591_v3  ;;  %v1042_v11 = vadd.f32 %v2372_v44, %v892_v40  ;;  %v1190_v57 = vadd.f32 %v1159_v62, %v1040_v28  ;;  %v745_v29 = vadd.f32 %v3102_v41, %v595_v58  ;;  %v3181_v41 = vld [vmem:[#allocation4_spill] sm:$0xff]  ;;  %v3185_v3 = vld [vmem:[#allocation9_spill] sm:$0xff] }
 0x215   : > { %v1047_v62 = vadd.f32 %v3181_v41, %v897_v26 }
 0x216   : > { %v891_v24 = vadd.f32 %v862_v43, %v741_v63  ;;  %v1192_v51 = vadd.f32 %v2396_v59, %v1042_v11  ;;  %v1046_v43 = vadd.f32 %v3110_v56, %v896_v27  ;;  %v895_v30 = vadd.f32 %v3108_v55, %v745_v29 }
 0x217   : > { %v1340_v45 = vadd.f32 %v1309_v20, %v1190_v57  ;;  %v3184_v55 = vld [vmem:[#allocation7_spill] sm:$0xff] }
 0x218   : > { %v1041_v35 = vadd.f32 %v1012_v54, %v891_v24  ;;  %v1342_v36 = vadd.f32 %v2420_v32, %v1192_v51  ;;  %v1044_v54 = vadd.f32 %v3180_v49, %v894_v34  ;;  %v1196_v59 = vadd.f32 %v2400_v60, %v1046_v43 }
 0x219   : > { %v1045_v5 = vadd.f32 %v3182_v50, %v895_v30  ;;  %v1197_v1 = vadd.f32 %v3184_v55, %v1047_v62  ;;  %v3186_v40 = vld [vmem:[#allocation8_spill] sm:$0xff] }
 0x21a   : > { %v1191_v39 = vadd.f32 %v1162_v25, %v1041_v35  ;;  %v3183_v25 = vld [vmem:[#allocation6_spill] sm:$0xff] }
 0x21b   : > { %v1194_v32 = vadd.f32 %v3183_v25, %v1044_v54  ;;  %v1195_v60 = vadd.f32 %v3186_v40, %v1045_v5  ;;  %v1347_v19 = vadd.f32 %v3188_v9, %v1197_v1 }
 0x21c   : > { %v1341_v48 = vadd.f32 %v1312_v2, %v1191_v39 }
 0x21d   : > { %v2468_v6 = vpop.f32.mrf.mxu0 }
 0x21f   : > { %v1610_v17 = vpop.f32.mrf.mxu0 }
 0x221   : > { %v2469_v46 = vpop.f32.mrf.mxu0 }
 0x223   : > { %v2444_v22 = vpop.f32.mrf.mxu1  ;;  %v1613_v44 = vpop.f32.mrf.mxu0 }
 0x224   : > { %v1493_v37 = vadd.f32 %v2444_v22, %v1342_v36  ;;  %v1346_v22 = vadd.f32 %v3185_v3, %v1196_v59 }
 0x225   : > { %v1460_v7 = vpop.f32.mrf.mxu1  ;;  %v2472_v56 = vpop.f32.mrf.mxu0 }
 0x226   : > { %v1491_v8 = vadd.f32 %v1460_v7, %v1340_v45  ;;  %v1643_v20 = vadd.f32 %v2468_v6, %v1493_v37  ;;  %v3187_v7 = vld [vmem:[#allocation10_spill] sm:$0xff] }
 0x227   : > { %v2445_v42 = vpop.f32.mrf.mxu1  ;;  %v1626_v16 = vpop.f32.mrf.mxu0 }
 0x228   : > { %v1494_v12 = vadd.f32 %v2445_v42, %v1343_v47  ;;  %v1641_v4 = vadd.f32 %v1610_v17, %v1491_v8  ;;  %v1344_v42 = vadd.f32 %v3187_v7, %v1194_v32 }
 0x229   : > { %v1463_v13 = vpop.f32.mrf.mxu1  ;;  %v2473_v21 = vpop.f32.mrf.mxu0 }
 0x22a   : > { %v1492_v0 = vadd.f32 %v1463_v13, %v1341_v48  ;;  %v1644_v11 = vadd.f32 %v2469_v46, %v1494_v12  ;;  %v3189_v13 = vld [vmem:[#allocation12_spill] sm:$0xff] }
 0x22b   : > { %v2448_v38 = vpop.f32.mrf.mxu1  ;;  %v1345_v58 = vadd.f32 %v3189_v13, %v1195_v60  ;;  %v1629_v39 = vpop.f32.mrf.mxu0 }
 0x22c   : > { %v1497_v63 = vadd.f32 %v2448_v38, %v1346_v22  ;;  %v1642_v24 = vadd.f32 %v1613_v44, %v1492_v0 }
 0x22d   : > { %v1476_v23 = vpop.f32.mrf.mxu1 }
 0x22e   : > { %v1495_v28 = vadd.f32 %v1476_v23, %v1344_v42  ;;  %v1647_v46 = vadd.f32 %v2472_v56, %v1497_v63 }
 0x22f   : > { %v2449_v18 = vpop.f32.mrf.mxu1 }
 0x230   : > { %v1498_v51 = vadd.f32 %v2449_v18, %v1347_v19  ;;  %v1645_v26 = vadd.f32 %v1626_v16, %v1495_v28 }
 0x231   : > { %v1479_v14 = vpop.f32.mrf.mxu1 }
 0x232   : > { %v1496_v35 = vadd.f32 %v1479_v14, %v1345_v58  ;;  %v1648_v23 = vadd.f32 %v2473_v21, %v1498_v51 }
 0x234   : > { %v1646_v30 = vadd.f32 %v1629_v39, %v1496_v35 }
 0x243   : > { %v2492_v61 = vpop.f32.mrf.mxu1 }
 0x244   : > { %v1793_v2 = vadd.f32 %v2492_v61, %v1643_v20 }
 0x245   : > { %v1760_v10 = vpop.f32.mrf.mxu1 }
 0x246   : > { %v1791_v53 = vadd.f32 %v1760_v10, %v1641_v4  ;;  %v1801_v33 = vmax.f32 %v1793_v2, 0.0 }
 0x247   : > { %v2493_v52 = vpop.f32.mrf.mxu1 }
 0x248   : > { %v1794_v6 = vadd.f32 %v2493_v52, %v1644_v11  ;;  %v1799_v57 = vmax.f32 %v1791_v53, 0.0 }
 0x249   : > { %v1763_v31 = vpop.f32.mrf.mxu1 }
 0x24a   : > { %v1802_v17 = vmax.f32 %v1794_v6, 0.0  ;;  %v1792_v27 = vadd.f32 %v1763_v31, %v1642_v24 }
 0x24b   : > { %v2496_v38 = vpop.f32.mrf.mxu1 }
 0x24c   : > { %v2159_v15 = vpack.c.bf16 %v1802_v17, %v1801_v33  ;;  %v1800_v29 = vmax.f32 %v1792_v27, 0.0  ;;  %v1797_v36 = vadd.f32 %v2496_v38, %v1647_v46 }
 0x24d   : > { %v1776_v34 = vpop.f32.mrf.mxu1 }
 0x24e   : > { %2171 = vst [vmem:[%s197_s17 + $0x8] sm:$0xff] %v2159_v15   ;;  %v2154_v18 = vpack.c.bf16 %v1800_v29, %v1799_v57  ;;  %v1795_v44 = vadd.f32 %v1776_v34, %v1645_v26  ;;  %v1805_v37 = vmax.f32 %v1797_v36, 0.0 }
 0x24f   : > { %v2497_v43 = vpop.f32.mrf.mxu1 }
 0x250   : > { %2155 = vst [vmem:[%s197_s17] sm:$0xff] %v2154_v18   ;;  %v1798_v45 = vadd.f32 %v2497_v43, %v1648_v23  ;;  %v1803_v59 = vmax.f32 %v1795_v44, 0.0 }
 0x251   : > { %v1779_v47 = vpop.f32.mrf.mxu1 }
 0x252   : > { %v1806_v49 = vmax.f32 %v1798_v45, 0.0  ;;  %v1796_v54 = vadd.f32 %v1779_v47, %v1646_v30 }
 0x254   : > { %v2169_v14 = vpack.c.bf16 %v1806_v49, %v1805_v37  ;;  %v1804_v41 = vmax.f32 %v1796_v54, 0.0 }
 0x256   : > { %2173 = vst [vmem:[%s197_s17 + $0x18] sm:$0xff] %v2169_v14   ;;  %v2164_v62 = vpack.c.bf16 %v1804_v41, %v1803_v59 }
 0x258   : > { %2172 = vst [vmem:[%s197_s17 + $0x10] sm:$0xff] %v2164_v62  }
 0x259 PF: > { %s14_s15 = sadd.s32 1, %s2615_s15  }
 0x25a   : > { %p11_p4 = scmp.ge.s32.totalorder %s14_s15, 4  }
 0x25c   :  { %13 = sbr.rel (!%p11_p4) target bundleno = 1 (0x1), region = 76 }

</bundles_post_ra>
